<compile_context>
chip_gen: v7x
topology: tpu7x:2x2x1
jax: 0.10.0
libtpu: 0.0.40
codegen_flags: <defaults>
</compile_context>

<pallas_src>
import functools

import jax
import jax.numpy as jnp
import numpy as np
from jax.experimental import pallas as pl
from jax.experimental.pallas import tpu as pltpu


def _head_kernel(inv_hw, feat_ref, w_fc_ref, b_fc_ref, out_ref):
    # feat_ref block: (BB, HW, C) in the backbone's dtype (f32 here).
    x = feat_ref[...]
    # Global average pool over the HW axis: single fused reduction, f32
    # accumulation — no materialised f32 copy of the feature tile.
    pooled = jnp.sum(x, axis=1, dtype=jnp.float32) * inv_hw          # (BB, C)
    # TODO(synk): Dropout(p=0.5) is an inference-time identity at this point.
    # Linear(C -> num_classes), classes padded to a lane-dense 128-wide block;
    # tiny (BB, C) x (C, 128) matmul kept in f32 (no bf16 rounding needed).
    logits = jnp.dot(pooled, w_fc_ref[...],
                     preferred_element_type=jnp.float32) + b_fc_ref[...]
    out_ref[...] = logits.astype(out_ref.dtype)


def _pick_block_b(batch, hw, channels, feat_itemsize, tile_budget_bytes=4 << 20):
    """Pick the batch tile BB.

    Constraints / goals (per review):
      * BB divides B and is a multiple of 8 (output-block sublane alignment),
        unless BB == B (full dim, also legal).
      * target >= 4 and even grid steps so each v7x TensorCore gets >= 2
        pipelined steps (falls back to >= 2, then 1).
      * per-buffer feature tile bounded (~4 MiB default) — it is double
        buffered; the budget fits v5e's 16 MiB default scoped VMEM with room
        for the (single-buffered) weights and temporaries.
    """
    if batch < 16 or batch % 8:
        return batch
    cands = [c for c in range(8, batch + 1, 8) if batch % c == 0]
    fitting = [c for c in cands
               if c * hw * channels * feat_itemsize <= tile_budget_bytes]
    if not fitting:
        fitting = cands[:1]                  # smallest multiple-of-8 divisor
    for good in (lambda s: s >= 4 and s % 2 == 0,
                 lambda s: s >= 2,
                 lambda s: True):
        sel = [c for c in fitting if good(batch // c)]
        if sel:
            return max(sel)                  # fewest steps among acceptable
    return fitting[0]


def _estimate_vmem_bytes(bb, hw, channels, nc_pad, feat_itemsize):
    feat_tile = bb * hw * channels * feat_itemsize   # one pipeline buffer
    out_tile = bb * nc_pad * 4
    weights = (channels * nc_pad + nc_pad) * 4       # w_fc + b_fc, 1 buffer
    temps = bb * channels * 4 + bb * nc_pad * 4      # pooled + logits
    # features & output double-buffered by the BlockSpec pipeline; weights
    # requested single-buffered (pl.Buffered(1)).
    return 2 * feat_tile + 2 * out_tile + weights + temps


def _block_spec(shape, index_map, buffer_count=None):
    if buffer_count is not None:
        try:
            return pl.BlockSpec(shape, index_map,
                                pipeline_mode=pl.Buffered(buffer_count))
        except Exception:        # older JAX: no pipeline_mode / pl.Buffered
            pass
    return pl.BlockSpec(shape, index_map)


def medical_cnn_head_forward(features_nhwc, w_fc, b_fc, *,
                             block_b=None, feature_buffers=None):
    """MedicalCNN forward, downstream of the conv backbone.

    features_nhwc: [B, H, W, C] channels-last map from backbone.forward_features
      (any float dtype, consumed as-is — no wrapper cast / pad pre-pass).
    w_fc: [C, num_classes]  (PyTorch nn.Linear weight [out, in], pre-transposed)
    b_fc: [num_classes] or [1, num_classes]
    feature_buffers: optional pipeline depth for the feature BlockSpec (e.g. 3
      on v6e if xprof shows exposed feature DMA); default = Pallas default (2).
    """
    B, H, W, C = features_nhwc.shape
    HW = H * W
    num_classes = w_fc.shape[-1]
    nc_pad = max(128, ((num_classes + 127) // 128) * 128)   # lane-dense output

    # Free metadata reshape; trailing block dims (HW, C) equal the full array
    # dims, so no (8,128) padding and no extra HBM pass are required.
    feats = features_nhwc.reshape(B, HW, C)

    # Head parameters: f32 (tiny matmul — no bandwidth reason to round to
    # bf16), zero-padded to the lane-dense class width.
    w_fc_k = jnp.pad(w_fc.astype(jnp.float32),
                     ((0, 0), (0, nc_pad - num_classes)))
    b_fc_k = jnp.pad(b_fc.reshape(1, -1).astype(jnp.float32),
                     ((0, 0), (0, nc_pad - num_classes)))

    BB = block_b if block_b is not None else _pick_block_b(
        B, HW, C, feats.dtype.itemsize)
    assert B % BB == 0 and (BB % 8 == 0 or BB == B)

    vmem_limit = int(min(64 << 20,
                         max(16 << 20,
                             2 * _estimate_vmem_bytes(
                                 BB, HW, C, nc_pad, feats.dtype.itemsize))))

    kernel = functools.partial(_head_kernel, float(1.0 / HW))

    def run(use_pipeline_modes):
        feat_spec = _block_spec(
            (BB, HW, C), lambda b: (b, 0, 0),
            feature_buffers if use_pipeline_modes else None)
        # Constant index maps: weights stay VMEM-resident across the batch
        # loop; Buffered(1) removes their pointless second pipeline buffer.
        w_spec = _block_spec(w_fc_k.shape, lambda b: (0, 0),
                             1 if use_pipeline_modes else None)
        bias_spec = _block_spec(b_fc_k.shape, lambda b: (0, 0),
                                1 if use_pipeline_modes else None)
        return pl.pallas_call(
            kernel,
            out_shape=jax.ShapeDtypeStruct((B, nc_pad), jnp.float32),
            grid_spec=pltpu.PrefetchScalarGridSpec(
                num_scalar_prefetch=0,
                grid=(B // BB,),
                in_specs=[feat_spec, w_spec, bias_spec],
                out_specs=pl.BlockSpec((BB, nc_pad), lambda b: (b, 0)),
            ),
            compiler_params=pltpu.CompilerParams(
                dimension_semantics=("parallel",),
                vmem_limit_bytes=vmem_limit),
        )(feats, w_fc_k, b_fc_k)

    try:
        out = run(True)
    except Exception:
        # JAX versions without BlockSpec.pipeline_mode / Buffered(1) lowering.
        out = run(False)
    return out[:, :num_classes]


def reference_forward(features_nhwc, w_fc, b_fc):
    """Pure-JAX f32 reference mirroring MedicalCNN.forward after the conv
    features: global average pool -> Dropout (identity) -> Linear."""
    B, H, W, C = features_nhwc.shape
    pooled = jnp.mean(features_nhwc.reshape(B, H * W, C).astype(jnp.float32),
                      axis=1)
    return pooled @ w_fc.astype(jnp.float32) + b_fc.reshape(1, -1).astype(jnp.float32)


if __name__ == "__main__":
    # resnet50-like 7x7 spatial map; small channel count for the test (real
    # resnet50 uses C=2048); B=32 gives BB=8 -> 4 even "parallel" grid steps.
    B, H, W, C = 32, 7, 7, 128
    num_classes = 7

    key = jax.random.PRNGKey(0)
    k_feat, k_w, k_b = jax.random.split(key, 3)
    # Channels-last features straight from the (not reproduced) timm backbone.
    features = jax.random.normal(k_feat, (B, H, W, C), dtype=jnp.float32)
    # PyTorch nn.Linear weight [out, in] stored pre-transposed as [in, out].
    w_fc = (0.05 * jax.random.normal(k_w, (C, num_classes))).astype(jnp.float32)
    b_fc = (0.02 * jax.random.normal(k_b, (1, num_classes))).astype(jnp.float32)

    out = medical_cnn_head_forward(features, w_fc, b_fc)
    out = jax.block_until_ready(out)

    ref = reference_forward(features, w_fc, b_fc)
    assert out.shape == (B, num_classes)
    np.testing.assert_allclose(np.asarray(out), np.asarray(ref),
                               rtol=2e-3, atol=2e-3)

    print("KERNEL_OK")
</pallas_src>

<mosaic_0001>
module attributes {stable_mosaic.version = 11 : i64} {
  func.func @_head_kernel(%arg0: i32, %arg1: memref<8x49x128xf32, #tpu.memory_space<vmem>>, %arg2: memref<128x128xf32, #tpu.memory_space<vmem>>, %arg3: memref<1x128xf32, #tpu.memory_space<vmem>>, %arg4: memref<8x128xf32, #tpu.memory_space<vmem>>) attributes {dimension_semantics = [#tpu.dimension_semantics<parallel>], iteration_bounds = array<i64: 4>, scalar_prefetch = 0 : i64, scratch_operands = 0 : i64, tpu.core_type = #tpu.core_type<tc>, window_params = [{transform_indices = @transform_0, window_bounds = array<i64: 8, 49, 128>}, {pipeline_mode = #tpu.pipeline_mode<synchronous>, transform_indices = @transform_1, window_bounds = array<i64: 128, 128>}, {pipeline_mode = #tpu.pipeline_mode<synchronous>, transform_indices = @transform_2, window_bounds = array<i64: 1, 128>}, {transform_indices = @transform_3, window_bounds = array<i64: 8, 128>}]} {
    %c0 = arith.constant 0 : index
    %c0_0 = arith.constant 0 : index
    %c0_1 = arith.constant 0 : index
    %0 = vector.load %arg1[%c0, %c0_0, %c0_1] : memref<8x49x128xf32, #tpu.memory_space<vmem>>, vector<8x49x128xf32>
    %cst = arith.constant dense<0.000000e+00> : vector<8x128xf32>
    %1 = vector.multi_reduction <add>, %0, %cst [1] : vector<8x49x128xf32> to vector<8x128xf32>
    %cst_2 = arith.constant 0.0204081628 : f32
    %2 = vector.broadcast %cst_2 : f32 to vector<8x128xf32>
    %3 = arith.mulf %1, %2 : vector<8x128xf32>
    %c0_3 = arith.constant 0 : index
    %c0_4 = arith.constant 0 : index
    %4 = vector.load %arg2[%c0_3, %c0_4] : memref<128x128xf32, #tpu.memory_space<vmem>>, vector<128x128xf32>
    %cst_5 = arith.constant dense<0.000000e+00> : vector<8x128xf32>
    %5 = tpu.matmul %3, %4, %cst_5 {dimension_numbers = #tpu.dot_dimension_numbers<[1], [0], [0], [1], [0, 0, 1, 1], [], []>} : vector<8x128xf32>, vector<128x128xf32>, vector<8x128xf32> -> vector<8x128xf32>
    %c0_6 = arith.constant 0 : index
    %c0_7 = arith.constant 0 : index
    %6 = vector.load %arg3[%c0_6, %c0_7] : memref<1x128xf32, #tpu.memory_space<vmem>>, vector<1x128xf32>
    %7 = vector.broadcast %6 : vector<1x128xf32> to vector<8x128xf32>
    %8 = arith.addf %5, %7 : vector<8x128xf32>
    %c0_8 = arith.constant 0 : index
    %c0_9 = arith.constant 0 : index
    %9 = vector.load %arg4[%c0_8, %c0_9] : memref<8x128xf32, #tpu.memory_space<vmem>>, vector<8x128xf32>
    tpu.vector_store %arg4[%c0_8, %c0_9], %8 {strides = array<i32>} : memref<8x128xf32, #tpu.memory_space<vmem>>, vector<8x128xf32>,
    return
  }
  func.func @transform_0(%arg0: i32) -> (i32, i32, i32) {
    %c0_i32 = arith.constant 0 : i32
    %c0_i32_0 = arith.constant 0 : i32
    %c0_i32_1 = arith.constant 0 : i32
    return %arg0, %c0_i32, %c0_i32_0 : i32, i32, i32
  }
  func.func @transform_1(%arg0: i32) -> (i32, i32) {
    %c0_i32 = arith.constant 0 : i32
    %c0_i32_0 = arith.constant 0 : i32
    %c0_i32_1 = arith.constant 0 : i32
    return %c0_i32, %c0_i32_0 : i32, i32
  }
  func.func @transform_2(%arg0: i32) -> (i32, i32) {
    %c0_i32 = arith.constant 0 : i32
    %c0_i32_0 = arith.constant 0 : i32
    %c0_i32_1 = arith.constant 0 : i32
    return %c0_i32, %c0_i32_0 : i32, i32
  }
  func.func @transform_3(%arg0: i32) -> (i32, i32) {
    %c0_i32 = arith.constant 0 : i32
    %c0_i32_0 = arith.constant 0 : i32
    return %arg0, %c0_i32 : i32, i32
  }
}

module attributes {stable_mosaic.version = 11 : i64} {
  func.func @_head_kernel(%arg0: i32, %arg1: memref<8x49x128xf32, #tpu.memory_space<vmem>>, %arg2: memref<128x128xf32, #tpu.memory_space<vmem>>, %arg3: memref<1x128xf32, #tpu.memory_space<vmem>>, %arg4: memref<8x128xf32, #tpu.memory_space<vmem>>) attributes {dimension_semantics = [#tpu.dimension_semantics<parallel>], iteration_bounds = array<i64: 4>, scalar_prefetch = 0 : i64, scratch_operands = 0 : i64, tpu.core_type = #tpu.core_type<tc>, window_params = [{transform_indices = @transform_0, window_bounds = array<i64: 8, 49, 128>}, {pipeline_mode = #tpu.pipeline_mode<synchronous>, transform_indices = @transform_1, window_bounds = array<i64: 128, 128>}, {pipeline_mode = #tpu.pipeline_mode<synchronous>, transform_indices = @transform_2, window_bounds = array<i64: 1, 128>}, {transform_indices = @transform_3, window_bounds = array<i64: 8, 128>}]} {
    %c0 = arith.constant 0 : index
    %c0_0 = arith.constant 0 : index
    %c0_1 = arith.constant 0 : index
    %0 = vector.load %arg1[%c0, %c0_0, %c0_1] : memref<8x49x128xf32, #tpu.memory_space<vmem>>, vector<8x49x128xf32>
    %cst = arith.constant dense<0.000000e+00> : vector<8x128xf32>
    %1 = vector.multi_reduction <add>, %0, %cst [1] : vector<8x49x128xf32> to vector<8x128xf32>
    %cst_2 = arith.constant 0.0204081628 : f32
    %2 = vector.broadcast %cst_2 : f32 to vector<8x128xf32>
    %3 = arith.mulf %1, %2 : vector<8x128xf32>
    %c0_3 = arith.constant 0 : index
    %c0_4 = arith.constant 0 : index
    %4 = vector.load %arg2[%c0_3, %c0_4] : memref<128x128xf32, #tpu.memory_space<vmem>>, vector<128x128xf32>
    %cst_5 = arith.constant dense<0.000000e+00> : vector<8x128xf32>
    %5 = tpu.matmul %3, %4, %cst_5 {dimension_numbers = #tpu.dot_dimension_numbers<[1], [0], [0], [1], [0, 0, 1, 1], [], []>} : vector<8x128xf32>, vector<128x128xf32>, vector<8x128xf32> -> vector<8x128xf32>
    %c0_6 = arith.constant 0 : index
    %c0_7 = arith.constant 0 : index
    %6 = vector.load %arg3[%c0_6, %c0_7] : memref<1x128xf32, #tpu.memory_space<vmem>>, vector<1x128xf32>
    %7 = vector.broadcast %6 : vector<1x128xf32> to vector<8x128xf32>
    %8 = arith.addf %5, %7 : vector<8x128xf32>
    %c0_8 = arith.constant 0 : index
    %c0_9 = arith.constant 0 : index
    %9 = vector.load %arg4[%c0_8, %c0_9] : memref<8x128xf32, #tpu.memory_space<vmem>>, vector<8x128xf32>
    tpu.vector_store %arg4[%c0_8, %c0_9], %8 {strides = array<i32>} : memref<8x128xf32, #tpu.memory_space<vmem>>, vector<8x128xf32>,
    return
  }
  func.func @transform_0(%arg0: i32) -> (i32, i32, i32) {
    %c0_i32 = arith.constant 0 : i32
    %c0_i32_0 = arith.constant 0 : i32
    %c0_i32_1 = arith.constant 0 : i32
    return %arg0, %c0_i32, %c0_i32_0 : i32, i32, i32
  }
  func.func @transform_1(%arg0: i32) -> (i32, i32) {
    %c0_i32 = arith.constant 0 : i32
    %c0_i32_0 = arith.constant 0 : i32
    %c0_i32_1 = arith.constant 0 : i32
    return %c0_i32, %c0_i32_0 : i32, i32
  }
  func.func @transform_2(%arg0: i32) -> (i32, i32) {
    %c0_i32 = arith.constant 0 : i32
    %c0_i32_0 = arith.constant 0 : i32
    %c0_i32_1 = arith.constant 0 : i32
    return %c0_i32, %c0_i32_0 : i32, i32
  }
  func.func @transform_3(%arg0: i32) -> (i32, i32) {
    %c0_i32 = arith.constant 0 : i32
    %c0_i32_0 = arith.constant 0 : i32
    return %arg0, %c0_i32 : i32, i32
  }
}

</mosaic_0001>

<bundles_post_ra>
// kernel: tpu_custom_call.1
= control target key start
LH: loop header
LB: loop body
LE: loop exit
PB: predicated region body
PF: predicated region fallthrough
CT: control target
= control target key end

     0   :  { %8 = vsyncpa [#allocation3], 0  ;;  %s998_s0 = inlined_call_operand.vmem [shape: f32[32,49,128], index: 0, kind: input, shape index: {}]   ;;  %s999_s1 = inlined_call_operand.vmem [shape: f32[128,128], index: 1, kind: input, shape index: {}]   ;;  %s1000_s2 = inlined_call_operand.vmem [shape: f32[1,128], index: 2, kind: input, shape index: {}]   ;;  %s1001_s3 = inlined_call_operand.hbm [shape: f32[32,128], index: 3, kind: output, shape index: {}]  }
   0x1   :  { %10 = vsyncpa [#allocation3 + $0x1], 0  ;;  %s752_s12 = smov 0   ;;  %s754_s13 = smov 0  }
   0x2   :  { %s756_s14 = smov 0   ;;  %s758_s15 = smov 0  }
   0x3 LB: > { %s773_s16 = sadd.s32 4294967295, %s726_s15   ;;  %s533_s17 = sadd.s32 4294967294, %s726_s15   ;;  %s726_s15 = sphi %s758_s15, %s1007_s15   ;;  %s722_s14 = sphi %s756_s14, %s1006_s14   ;;  %s718_s13 = sphi %s754_s13, %s1005_s13   ;;  %s714_s12 = sphi %s752_s12, %s1004_s12  }
   0x4   : > { %s777_s18 = sadd.s32 1, %s726_s15   ;;  %s91_s19 = sadd.s32 1, %s722_s14 }
   0x5   : > { %s88_s20 = ssub.s32 %s726_s15, %s777_s18  ;;  %p101_p0 = scmp.ne.s32.totalorder %s722_s14, %s718_s13 }
   0x6   : > { %p89_p1 = scmp.eq.s32.totalorder %s88_s20, 0  ;;  %p102_p2 = scmp.eq.s32.totalorder %s773_s16, 3 }
   0x7   : > { %p107_p3 = scmp.ne.s32.totalorder %s718_s13, %s714_s12  ;;  %p108_p4 = scmp.eq.s32.totalorder %s533_s17, 3 }
   0x8   : > { %s788_s21 = scalar_select %p89_p1, %s722_s14, %s91_s19  }
   0x9   : > { %p790_p5 = por %p102_p2, %p101_p0  ;;  %p794_p6 = por %p108_p4, %p107_p3 }
   0xa   : > { %p536_p7 = scmp.ge.s32.totalorder %s726_s15, 1  ;;  %p142_p8 = scmp.lt.s32.totalorder %s726_s15, 5 }
   0xc   : > { %p143_p9 = pnand %p536_p7, %p142_p8 }
   0xd   : > { %v343_v0 = vld [vmem:[%s999_s1] sm:$0xff] (!%p143_p9)  ;;  %v344_v1 = vld [vmem:[%s999_s1 + $0x8] sm:$0xff] (!%p143_p9)  ;;  %v345_v2 = vld [vmem:[%s999_s1 + $0x10] sm:$0xff] (!%p143_p9)  ;;  %v728_v3 = vmov (!%p143_p9), 0.0|0.0   ;;  %vm729_vm0 = vmmov (!%p143_p9), 0   ;;  %v730_v6 = vmov (!%p143_p9), 0.0  }
   0xe   : > { %146 = sbr.rel (%p143_p9) target bundleno = 299 (0x12b), region = 32  ;;  %597 = vmatprep.subr.bf16.mxu0 (!%p143_p9), %v728_v3  ;;  %v598_v4 = vpack.c.bf16 (!%p143_p9), %v344_v1, %v343_v0  ;;  %v346_v5 = vld [vmem:[%s999_s1 + $0x18] sm:$0xff] (!%p143_p9)  ;;  %594 = vmatprep.mubr.msk.f32.mxu0 (!%p143_p9), %vm729_vm0, %v730_v6  ;;  %s538_s5 = sshll.u32 (!%p143_p9), %s773_s16, 3  ;;  %v347_v8 = vld [vmem:[%s999_s1 + $0x20] sm:$0xff] (!%p143_p9)  ;;  %v348_v9 = vld [vmem:[%s999_s1 + $0x28] sm:$0xff] (!%p143_p9)  ;;  %vm235_vm1 = vcmask (!%p143_p9), 1040384  }
   0xf   : > { %p168_p10 = scmp.lt.s32.totalorder (!%p143_p9), %s538_s5, 31  ;;  %v601_v7 = vpack.c.bf16 (!%p143_p9), %v346_v5, %v345_v2  ;;  %v604_v10 = vpack.c.bf16 (!%p143_p9), %v348_v9, %v347_v8  ;;  %v349_v11 = vld [vmem:[%s999_s1 + $0x30] sm:$0xff] (!%p143_p9)  ;;  %v350_v12 = vld [vmem:[%s999_s1 + $0x38] sm:$0xff] (!%p143_p9)  ;;  %v351_v16 = vld [vmem:[%s999_s1 + $0x40] sm:$0xff] (!%p143_p9)  ;;  %vm374_vm2 = vcmask (!%p143_p9), 1041409   ;;  %vm376_vm3 = vcmask (!%p143_p9), 1042434  }
  0x10   : > { %599 = vmatpush3.bf16.msra.mxu0 (!%p143_p9), %v598_v4  ;;  %v607_v18 = vpack.c.bf16 (!%p143_p9), %v350_v12, %v349_v11  ;;  %v352_v22 = vld [vmem:[%s999_s1 + $0x48] sm:$0xff] (!%p143_p9)  ;;  %v851_v27 = vld [vmem:[%s999_s1 + $0x50] sm:$0xff] (!%p143_p9)  ;;  %v856_v28 = vld [vmem:[%s999_s1 + $0x58] sm:$0xff] (!%p143_p9)  ;;  %vm378_vm4 = vcmask (!%p143_p9), 1043459   ;;  %vm380_vm5 = vcmask (!%p143_p9), 1044484   ;;  %vm382_vm6 = vcmask (!%p143_p9), 1045509  }
  0x11   : > { %600 = vmatprep.subr.bf16.mxu0 (!%p143_p9), %v728_v3  ;;  %v610_v37 = vpack.c.bf16 (!%p143_p9), %v352_v22, %v351_v16  ;;  %v867_v38 = vld [vmem:[%s999_s1 + $0x60] sm:$0xff] (!%p143_p9)  ;;  %v872_v39 = vld [vmem:[%s999_s1 + $0x68] sm:$0xff] (!%p143_p9)  ;;  %v877_v40 = vld [vmem:[%s999_s1 + $0x70] sm:$0xff] (!%p143_p9)  ;;  %v613_v57 = vpack.c.bf16 (!%p143_p9), %v856_v28, %v851_v27  ;;  %vm384_vm7 = vcmask (!%p143_p9), 1046534   ;;  %vm386_vm8 = vcmask (!%p143_p9), 1047559   ;;  %s164_s25 = sand.u32 (!%p143_p9), 1, %s718_s13  }
  0x12   : > { %v882_v41 = vld [vmem:[%s999_s1 + $0x78] sm:$0xff] (!%p143_p9)  ;;  %v616_v8 = vpack.c.bf16 (!%p143_p9), %v872_v39, %v867_v38  ;;  %s542_s29 = sshll.u32 (!%p143_p9), %s773_s16, 7  ;;  %s461_s8 = scalar_lea.sflag (!%p143_p9), [#allocation3], %s164_s25 }
  0x13   : > { %v619_v9 = vpack.c.bf16 (!%p143_p9), %v882_v41, %v877_v40  ;;  %s956_s7 = scalar_lea.hbm (!%p143_p9), %s1001_s3, %s542_s29  ;;  %s731_s16 = smov (!%p143_p9), [#allocation2]  }
  0x14   : > { %602 = vmatpush3.bf16.msra.mxu0 (!%p143_p9), %v601_v7 }
  0x15   : > { %s1009_s5 = smov (!%p168_p10, %s538_s5), 31  ;;  %603 = vmatprep.subr.bf16.mxu0 %v728_v3 }
  0x16   : > { %s621_s10 = smul.u32 56, %s1009_s5 }
  0x18   : > { %s831_s26 = scalar_lea.vmem %s998_s0, %s621_s10  ;;  %605 = vmatpush3.bf16.msra.mxu0 %v604_v10  ;;  %s668_s10 = sshll.u32 %s731_s16, 4  ;;  %s669_s10 = int_to_ptr.vmem [resolvable:$false] %s668_s10 }
  0x19   : > { %v174_v13 = vld [vmem:[%s831_s26] sm:$0xff]  ;;  %v175_v14 = vld [vmem:[%s831_s26 + $0x8] sm:$0xff]  ;;  %v176_v15 = vld [vmem:[%s831_s26 + $0x10] sm:$0xff]  ;;  %606 = vmatprep.subr.bf16.mxu0 %v728_v3  ;;  %s670_s11 = scalar_lea.vmem %s669_s10, 256 }
  0x1a   : > { %v230_v17 = vadd.f32 %v175_v14, %v174_v13  ;;  %v177_v19 = vld [vmem:[%s831_s26 + $0x18] sm:$0xff]  ;;  %v182_v21 = vld [vmem:[%s831_s26 + $0x40] sm:$0xff]  ;;  %v183_v24 = vld [vmem:[%s831_s26 + $0x48] sm:$0xff] }
  0x1b   : > { %v181_v20 = vld [vmem:[%s831_s26 + $0x38] sm:$0xff]  ;;  %v178_v23 = vld [vmem:[%s831_s26 + $0x20] sm:$0xff]  ;;  %v179_v29 = vld [vmem:[%s831_s26 + $0x28] sm:$0xff] }
  0x1c   : > { %v231_v25 = vadd.f32 %v230_v17, %v176_v15  ;;  %v244_v26 = vadd.f32 %v182_v21, %v181_v20  ;;  %v184_v30 = vld [vmem:[%s831_s26 + $0x50] sm:$0xff]  ;;  %v189_v33 = vld [vmem:[%s831_s26 + $0x78] sm:$0xff]  ;;  %v190_v34 = vld [vmem:[%s831_s26 + $0x80] sm:$0xff]  ;;  %608 = vmatpush3.bf16.msra.mxu0 %v607_v18 }
  0x1d   : > { %v188_v31 = vld [vmem:[%s831_s26 + $0x70] sm:$0xff]  ;;  %v185_v42 = vld [vmem:[%s831_s26 + $0x58] sm:$0xff]  ;;  %v187_v43 = vld [vmem:[%s831_s26 + $0x68] sm:$0x1]  ;;  %609 = vmatprep.subr.bf16.mxu0 %v728_v3 }
  0x1e   : > { %v180_v32 = vld [vmem:[%s831_s26 + $0x30] sm:$0x1]  ;;  %v232_v35 = vadd.f32 %v231_v25, %v177_v19  ;;  %v245_v36 = vadd.f32 %v244_v26, %v183_v24  ;;  %v191_v44 = vld [vmem:[%s831_s26 + $0x88] sm:$0xff]  ;;  %v257_v45 = vadd.f32 %v189_v33, %v188_v31  ;;  %v197_v48 = vld [vmem:[%s831_s26 + $0xb8] sm:$0xff]  ;;  %v249_v4 = vsel %vm235_vm1, %v187_v43, 0.0 }
  0x1f   : > { %v195_v46 = vld [vmem:[%s831_s26 + $0xa8] sm:$0xff]  ;;  %v196_v47 = vld [vmem:[%s831_s26 + $0xb0] sm:$0xff]  ;;  %v186_v51 = vld [vmem:[%s831_s26 + $0x60] sm:$0xff]  ;;  %v236_v54 = vsel %vm235_vm1, %v180_v32, 0.0 }
  0x20   : > { %v233_v49 = vadd.f32 %v232_v35, %v178_v23  ;;  %v246_v50 = vadd.f32 %v245_v36, %v184_v30  ;;  %v192_v52 = vld [vmem:[%s831_s26 + $0x90] sm:$0xff]  ;;  %v194_v53 = vld [vmem:[%s831_s26 + $0xa0] sm:$0x1]  ;;  %v258_v55 = vadd.f32 %v257_v45, %v190_v34  ;;  %v270_v56 = vadd.f32 %v196_v47, %v195_v46  ;;  %v193_v58 = vld [vmem:[%s831_s26 + $0x98] sm:$0xff]  ;;  %611 = vmatpush3.bf16.msra.mxu0 %v610_v37 }
  0x21   : > { %v198_v59 = vld [vmem:[%s831_s26 + $0xc0] sm:$0xff]  ;;  %v203_v61 = vld [vmem:[%s831_s26 + $0xe8] sm:$0xff]  ;;  %v201_v1 = vld [vmem:[%s831_s26 + $0xd8] sm:$0x1]  ;;  %612 = vmatprep.subr.bf16.mxu0 %v728_v3  ;;  %v262_v19 = vsel %vm235_vm1, %v194_v53, 0.0 }
  0x22   : > { %v202_v60 = vld [vmem:[%s831_s26 + $0xe0] sm:$0xff]  ;;  %v234_v62 = vadd.f32 %v233_v49, %v179_v29  ;;  %v247_v63 = vadd.f32 %v246_v50, %v185_v42  ;;  %v199_v0 = vld [vmem:[%s831_s26 + $0xc8] sm:$0xff]  ;;  %v204_v2 = vld [vmem:[%s831_s26 + $0xf0] sm:$0xff]  ;;  %v259_v5 = vadd.f32 %v258_v55, %v191_v44  ;;  %v271_v6 = vadd.f32 %v270_v56, %v197_v48 }
  0x23   : > { %v283_v7 = vadd.f32 %v203_v61, %v202_v60  ;;  %v205_v10 = vld [vmem:[%s831_s26 + $0xf8] sm:$0xff]  ;;  %v208_v11 = vld [vmem:[%s831_s26 + $0x110] sm:$0x1]  ;;  %v210_v16 = vld [vmem:[%s831_s26 + $0x120] sm:$0xff]  ;;  %v275_v27 = vsel %vm235_vm1, %v201_v1, 0.0 }
  0x24   : > { %v209_v12 = vld [vmem:[%s831_s26 + $0x118] sm:$0xff]  ;;  %v237_v13 = vadd.f32 %v236_v54, %v234_v62  ;;  %v248_v14 = vadd.f32 %v247_v63, %v186_v51  ;;  %v200_v15 = vld [vmem:[%s831_s26 + $0xd0] sm:$0xff]  ;;  %v211_v17 = vld [vmem:[%s831_s26 + $0x128] sm:$0xff]  ;;  %v260_v18 = vadd.f32 %v259_v5, %v192_v52  ;;  %v272_v20 = vadd.f32 %v271_v6, %v198_v59  ;;  %614 = vmatpush3.bf16.msra.mxu0 %v613_v57 }
  0x25   : > { %v284_v21 = vadd.f32 %v283_v7, %v204_v2  ;;  %v206_v22 = vld [vmem:[%s831_s26 + $0x100] sm:$0xff]  ;;  %v212_v23 = vld [vmem:[%s831_s26 + $0x130] sm:$0xff]  ;;  %v215_v24 = vld [vmem:[%s831_s26 + $0x148] sm:$0x1]  ;;  %v296_v28 = vadd.f32 %v210_v16, %v209_v12  ;;  %v288_v35 = vsel %vm235_vm1, %v208_v11, 0.0  ;;  %615 = vmatprep.subr.bf16.mxu0 %v728_v3 }
  0x26   : > { %v238_v25 = vrot.slane %v237_v13, 4  ;;  %v250_v26 = vadd.f32 %v249_v4, %v248_v14  ;;  %v216_v29 = vld [vmem:[%s831_s26 + $0x150] sm:$0xff]  ;;  %v217_v30 = vld [vmem:[%s831_s26 + $0x158] sm:$0xff]  ;;  %v218_v31 = vld [vmem:[%s831_s26 + $0x160] sm:$0xff]  ;;  %v261_v32 = vadd.f32 %v260_v18, %v193_v58  ;;  %v273_v33 = vadd.f32 %v272_v20, %v199_v0 }
  0x27   : > { %v285_v34 = vadd.f32 %v284_v21, %v205_v10  ;;  %v207_v36 = vld [vmem:[%s831_s26 + $0x108] sm:$0xff]  ;;  %v297_v39 = vadd.f32 %v296_v28, %v211_v17  ;;  %v309_v42 = vadd.f32 %v217_v30, %v216_v29  ;;  %v213_v43 = vld [vmem:[%s831_s26 + $0x138] sm:$0xff]  ;;  %v222_v45 = vld [vmem:[%s831_s26 + $0x180] sm:$0x1]  ;;  %v301_v49 = vsel %vm235_vm1, %v215_v24, 0.0 }
  0x28   : > { %v239_v37 = vadd.f32 %v238_v25, %v237_v13  ;;  %v251_v38 = vrot.slane %v250_v26, 4  ;;  %v219_v44 = vld [vmem:[%s831_s26 + $0x168] sm:$0xff]  ;;  %v263_v46 = vadd.f32 %v262_v19, %v261_v32  ;;  %v274_v47 = vadd.f32 %v273_v33, %v200_v15  ;;  %v224_v51 = vld [vmem:[%s831_s26 + $0x190] sm:$0xff]  ;;  %617 = vmatpush3.bf16.msra.mxu0 %v616_v8  ;;  %v214_v56 = vld [vmem:[%s831_s26 + $0x140] sm:$0xff] }
  0x29   : > { %v286_v48 = vadd.f32 %v285_v34, %v206_v22  ;;  %v223_v50 = vld [vmem:[%s831_s26 + $0x188] sm:$0xff]  ;;  %v298_v54 = vadd.f32 %v297_v39, %v212_v23  ;;  %v310_v55 = vadd.f32 %v309_v42, %v218_v31  ;;  %v220_v57 = vld [vmem:[%s831_s26 + $0x170] sm:$0xff]  ;;  %v314_v61 = vsel %vm235_vm1, %v222_v45, 0.0  ;;  %618 = vmatprep.subr.bf16.mxu0 %v728_v3  ;;  %v225_v62 = vld [vmem:[%s831_s26 + $0x198] sm:$0xff] }
  0x2a   : > { %v240_v52 = vrot.slane %v239_v37, 2  ;;  %v252_v53 = vadd.f32 %v251_v38, %v250_v26  ;;  %v264_v58 = vrot.slane %v263_v46, 4  ;;  %v276_v59 = vadd.f32 %v275_v27, %v274_v47  ;;  %v221_v4 = vld [vmem:[%s831_s26 + $0x178] sm:$0xff]  ;;  %v226_v10 = vld [vmem:[%s831_s26 + $0x1a0] sm:$0xff]  ;;  %v227_v19 = vld [vmem:[%s831_s26 + $0x1a8] sm:$0xff] }
  0x2b   : > { %v287_v60 = vadd.f32 %v286_v48, %v207_v36  ;;  %v299_v1 = vadd.f32 %v298_v54, %v213_v43  ;;  %v311_v2 = vadd.f32 %v310_v55, %v219_v44  ;;  %v322_v8 = vadd.f32 %v224_v51, %v223_v50  ;;  %v229_v3 = vld [vmem:[%s831_s26 + $0x1b8] sm:$0x1]  ;;  %v228_v28 = vld [vmem:[%s831_s26 + $0x1b0] sm:$0xff]  ;;  %s537_s26 = sshll.u32 %s164_s25, 3 }
  0x2c   : > { %v241_v63 = vadd.f32 %v240_v52, %v239_v37  ;;  %v253_v0 = vrot.slane %v252_v53, 2  ;;  %v265_v5 = vadd.f32 %v264_v58, %v263_v46  ;;  %v277_v6 = vrot.slane %v276_v59, 4  ;;  %620 = vmatpush3.bf16.msra.mxu0 %v619_v9  ;;  %s166_s30 = scalar_lea.vmem [#allocation2], %s537_s26 }
  0x2d   : > { %v289_v7 = vadd.f32 %v288_v35, %v287_v60  ;;  %v300_v13 = vadd.f32 %v299_v1, %v214_v56  ;;  %v312_v14 = vadd.f32 %v311_v2, %v220_v57  ;;  %v323_v18 = vadd.f32 %v322_v8, %v225_v62  ;;  %s474_s4 = sshll.u32 %s166_s30, 4  ;;  %s958_s4 = int_to_ptr.vmem [resolvable:$true] %s474_s4 }
  0x2e   : > { %v242_v11 = vrot.slane %v241_v63, 1  ;;  %v254_v12 = vadd.f32 %v253_v0, %v252_v53  ;;  %v266_v15 = vrot.slane %v265_v5, 2  ;;  %v278_v16 = vadd.f32 %v277_v6, %v276_v59  ;;  %s664_s9 = scalar_lea.vmem %s958_s4, 128  ;;  %p671_p0 = scmp.lt.s32.totalorder %s958_s4, %s669_s10 }
  0x2f   : > { %v290_v17 = vrot.slane %v289_v7, 4  ;;  %v302_v22 = vadd.f32 %v301_v49, %v300_v13  ;;  %v313_v23 = vadd.f32 %v312_v14, %v221_v4  ;;  %v324_v27 = vadd.f32 %v323_v18, %v226_v10  ;;  %v540_v14 = vld [vmem:[%s1000_s2] ss:$0 sm:$0xff]  ;;  %p665_p11 = scmp.ne.s32.totalorder %s958_s4, %s664_s9  ;;  %p672_p1 = scmp.lt.s32.totalorder %s670_s11, %s664_s9 }
  0x30   : > { %v243_v20 = vadd.f32 %v242_v11, %v241_v63  ;;  %v255_v21 = vrot.slane %v254_v12, 1  ;;  %v267_v24 = vadd.f32 %v266_v15, %v265_v5  ;;  %v279_v25 = vrot.slane %v278_v16, 2 }
  0x31   : > { %v291_v26 = vadd.f32 %v290_v17, %v289_v7  ;;  %v303_v30 = vrot.slane %v302_v22, 4  ;;  %v315_v40 = vadd.f32 %v314_v61, %v313_v23  ;;  %v327_v41 = vsel %vm235_vm1, %v229_v3, 0.0  ;;  %p666_p12 = pnand %p665_p11, %p790_p5  ;;  %p673_p2 = por %p672_p1, %p671_p0 }
  0x32   : > { %v256_v29 = vadd.f32 %v255_v21, %v254_v12  ;;  %v268_v9 = vrot.slane %v267_v24, 1  ;;  %v280_v31 = vadd.f32 %v279_v25, %v278_v16  ;;  %v325_v33 = vadd.f32 %v324_v27, %v227_v19 }
  0x33   : > { %v292_v32 = vrot.slane %v291_v26, 2  ;;  %v304_v34 = vadd.f32 %v303_v30, %v302_v22  ;;  %v316_v35 = vrot.slane %v315_v40, 4  ;;  %v335_v36 = vmul.f32 0.020408163, %v243_v20  ;;  %p667_p13 = pneg %p666_p12 }
  0x34   : > { %v336_v37 = vmul.f32 0.020408163, %v256_v29  ;;  %v269_v38 = vadd.f32 %v268_v9, %v267_v24  ;;  %v281_v39 = vrot.slane %v280_v31, 1  ;;  %v326_v43 = vadd.f32 %v325_v33, %v228_v28 }
  0x35   : > { %v293_v42 = vadd.f32 %v292_v32, %v291_v26  ;;  %v305_v44 = vrot.slane %v304_v34, 2  ;;  %v317_v45 = vadd.f32 %v316_v35, %v315_v40  ;;  %p674_p3 = pnand %p673_p2, %p667_p13 }
  0x36   : > { %v375_v46 = vsel %vm374_vm2, %v336_v37, %v335_v36  ;;  %v282_v47 = vadd.f32 %v281_v39, %v280_v31  ;;  %v328_v49 = vadd.f32 %v327_v41, %v326_v43  ;;  %v337_v50 = vmul.f32 0.020408163, %v269_v38 }
  0x37   : > { %v294_v48 = vrot.slane %v293_v42, 1  ;;  %v306_v51 = vadd.f32 %v305_v44, %v304_v34  ;;  %v318_v52 = vrot.slane %v317_v45, 2 }
  0x38   : > { %v329_v54 = vrot.slane %v328_v49, 4  ;;  %v338_v55 = vmul.f32 0.020408163, %v282_v47  ;;  %v377_v56 = vsel %vm376_vm3, %v337_v50, %v375_v46 }
  0x39   : > { %v295_v53 = vadd.f32 %v294_v48, %v293_v42  ;;  %v307_v57 = vrot.slane %v306_v51, 1  ;;  %v319_v58 = vadd.f32 %v318_v52, %v317_v45 }
  0x3a   : > { %v330_v59 = vadd.f32 %v329_v54, %v328_v49  ;;  %v379_v61 = vsel %vm378_vm4, %v338_v55, %v377_v56 }
  0x3b   : > { %v339_v60 = vmul.f32 0.020408163, %v295_v53  ;;  %v308_v62 = vadd.f32 %v307_v57, %v306_v51  ;;  %v320_v63 = vrot.slane %v319_v58, 1 }
  0x3c   : > { %v331_v0 = vrot.slane %v330_v59, 2 }
  0x3d   : > { %v321_v1 = vadd.f32 %v320_v63, %v319_v58  ;;  %v340_v2 = vmul.f32 0.020408163, %v308_v62  ;;  %v381_v4 = vsel %vm380_vm5, %v339_v60, %v379_v61 }
  0x3e   : > { %v332_v5 = vadd.f32 %v331_v0, %v330_v59 }
  0x3f   : > { %v341_v6 = vmul.f32 0.020408163, %v321_v1  ;;  %v383_v8 = vsel %vm382_vm6, %v340_v2, %v381_v4 }
  0x40   : > { %v333_v7 = vrot.slane %v332_v5, 1 }
  0x41   : > { %v385_v11 = vsel %vm384_vm7, %v341_v6, %v383_v8 }
  0x42   : > { %v334_v10 = vadd.f32 %v333_v7, %v332_v5 }
  0x44   : > { %v342_v12 = vmul.f32 0.020408163, %v334_v10 }
  0x46   : > { %v387_v13 = vsel %vm386_vm8, %v342_v12, %v385_v11 }
  0x47   : > { %595 = vmatmul.mubr.f32.vlgmr.msra.gmra.mrb[0].mxu0 %v387_v13 }
 0x11a   : > { %v455_v3 = vpop.f32.mrb[0].mxu0 }
 0x11b   : > { %v456_v15 = vadd.f32 %v540_v14, %v455_v3  ;;  %v596_v16 = vpop.f32.mrb[1].mxu0 }
 0x11d   : > { %459 = vst [vmem:[%s166_s30] sm:$0xff] %v456_v15 }
 0x11e   : > { %677 = shalt.err (!%p674_p3)
}
 0x11f   : > { %s678_s17 = scalar_lea.hbm %s956_s7, 128  ;;  %s682_s24 = scalar_lea.hbm %s1001_s3, 512 }
 0x120   : > { %p679_p4 = scmp.ne.s32.totalorder %s956_s7, %s678_s17  ;;  %p683_p9 = scmp.lt.u32.totalorder %s956_s7, %s1001_s3 }
 0x121   : > { %p684_p10 = scmp.lt.u32.totalorder %s682_s24, %s678_s17  ;;  %p686_p12 = scmp.lt.u32.totalorder %s678_s17, %s956_s7 }
 0x122   : > { %p680_p7 = pnand %p679_p4, %p790_p5 }
 0x123   : > { %p685_p11 = por %p684_p10, %p683_p9 }
 0x124   : > { %p681_p8 = pneg %p680_p7 }
 0x125   : > { %p687_p13 = por %p686_p12, %p685_p11 }
 0x127   : > { %p688_p0 = pnand %p687_p13, %p681_p8 }
 0x129   : > { %691 = shalt.err (!%p688_p0)
}
 0x12a   : > { %622 = dma.vmem_to_hbm [thread:$0]  (%p790_p5), %s958_s4, 128, %s956_s7, %s461_s8  }
 0x12b PF: > { %p628_p1 = scmp.ge.s32.totalorder %s726_s15, 2  ;;  %s486_s27 = sand.u32 1, %s714_s12  }
 0x12c   : > { %s487_s28 = scalar_lea.sflag [#allocation3], %s486_s27 }
 0x12d   : > { %p625_p2 = pnand %p628_p1, %p794_p6 }
 0x12f   : > { %709 = dma.done.wait (!%p625_p2), %s487_s28, 128  }
 0x130   : > { %711 = vsyncadd (!%p625_p2), %s487_s28, 4294967168  ;;  %p13_p3 = scmp.ge.s32.totalorder %s777_s18, 6   ;;  %s1004_s12 = smov %s718_s13 }
 0x131   : > { %s1005_s13 = smov %s722_s14  ;;  %s1006_s14 = smov %s788_s21 }
 0x132   : > { %s1007_s15 = smov %s777_s18  ;;  %15 = sbr.rel (!%p13_p3) target bundleno = 3 (0x3), region = 67 }
 0x139   :  { %492 = vsyncpa [#allocation3], 1 }
 0x13a   :  { %494 = vsyncpa [#allocation3 + $0x1], 1 }

// kernel: tpu_custom_call.1
= control target key start
LH: loop header
LB: loop body
LE: loop exit
PB: predicated region body
PF: predicated region fallthrough
CT: control target
= control target key end

     0   :  { %8 = vsyncpa [#allocation3], 0  ;;  %s998_s0 = inlined_call_operand.vmem [shape: f32[32,49,128], index: 0, kind: input, shape index: {}]   ;;  %s999_s1 = inlined_call_operand.vmem [shape: f32[128,128], index: 1, kind: input, shape index: {}]   ;;  %s1000_s2 = inlined_call_operand.vmem [shape: f32[1,128], index: 2, kind: input, shape index: {}]   ;;  %s1001_s3 = inlined_call_operand.hbm [shape: f32[32,128], index: 3, kind: output, shape index: {}]  }
   0x1   :  { %10 = vsyncpa [#allocation3 + $0x1], 0  ;;  %s752_s12 = smov 0   ;;  %s754_s13 = smov 0  }
   0x2   :  { %s756_s14 = smov 0   ;;  %s758_s15 = smov 0  }
   0x3 LB: > { %s773_s16 = sadd.s32 4294967295, %s726_s15   ;;  %s533_s17 = sadd.s32 4294967294, %s726_s15   ;;  %s726_s15 = sphi %s758_s15, %s1007_s15   ;;  %s722_s14 = sphi %s756_s14, %s1006_s14   ;;  %s718_s13 = sphi %s754_s13, %s1005_s13   ;;  %s714_s12 = sphi %s752_s12, %s1004_s12  }
   0x4   : > { %s777_s18 = sadd.s32 1, %s726_s15   ;;  %s91_s19 = sadd.s32 1, %s722_s14 }
   0x5   : > { %s88_s20 = ssub.s32 %s726_s15, %s777_s18  ;;  %p101_p0 = scmp.ne.s32.totalorder %s722_s14, %s718_s13 }
   0x6   : > { %p89_p1 = scmp.eq.s32.totalorder %s88_s20, 0  ;;  %p102_p2 = scmp.eq.s32.totalorder %s773_s16, 3 }
   0x7   : > { %p107_p3 = scmp.ne.s32.totalorder %s718_s13, %s714_s12  ;;  %p108_p4 = scmp.eq.s32.totalorder %s533_s17, 3 }
   0x8   : > { %s788_s21 = scalar_select %p89_p1, %s722_s14, %s91_s19  }
   0x9   : > { %p790_p5 = por %p102_p2, %p101_p0  ;;  %p794_p6 = por %p108_p4, %p107_p3 }
   0xa   : > { %p536_p7 = scmp.ge.s32.totalorder %s726_s15, 1  ;;  %p142_p8 = scmp.lt.s32.totalorder %s726_s15, 5 }
   0xc   : > { %p143_p9 = pnand %p536_p7, %p142_p8 }
   0xd   : > { %v343_v0 = vld [vmem:[%s999_s1] sm:$0xff] (!%p143_p9)  ;;  %v344_v1 = vld [vmem:[%s999_s1 + $0x8] sm:$0xff] (!%p143_p9)  ;;  %v345_v2 = vld [vmem:[%s999_s1 + $0x10] sm:$0xff] (!%p143_p9)  ;;  %v728_v3 = vmov (!%p143_p9), 0.0|0.0   ;;  %vm729_vm0 = vmmov (!%p143_p9), 0   ;;  %v730_v6 = vmov (!%p143_p9), 0.0  }
   0xe   : > { %146 = sbr.rel (%p143_p9) target bundleno = 299 (0x12b), region = 32  ;;  %597 = vmatprep.subr.bf16.mxu0 (!%p143_p9), %v728_v3  ;;  %v598_v4 = vpack.c.bf16 (!%p143_p9), %v344_v1, %v343_v0  ;;  %v346_v5 = vld [vmem:[%s999_s1 + $0x18] sm:$0xff] (!%p143_p9)  ;;  %594 = vmatprep.mubr.msk.f32.mxu0 (!%p143_p9), %vm729_vm0, %v730_v6  ;;  %s538_s5 = sshll.u32 (!%p143_p9), %s773_s16, 3  ;;  %v347_v8 = vld [vmem:[%s999_s1 + $0x20] sm:$0xff] (!%p143_p9)  ;;  %v348_v9 = vld [vmem:[%s999_s1 + $0x28] sm:$0xff] (!%p143_p9)  ;;  %vm235_vm1 = vcmask (!%p143_p9), 1040384  }
   0xf   : > { %p168_p10 = scmp.lt.s32.totalorder (!%p143_p9), %s538_s5, 31  ;;  %v601_v7 = vpack.c.bf16 (!%p143_p9), %v346_v5, %v345_v2  ;;  %v604_v10 = vpack.c.bf16 (!%p143_p9), %v348_v9, %v347_v8  ;;  %v349_v11 = vld [vmem:[%s999_s1 + $0x30] sm:$0xff] (!%p143_p9)  ;;  %v350_v12 = vld [vmem:[%s999_s1 + $0x38] sm:$0xff] (!%p143_p9)  ;;  %v351_v16 = vld [vmem:[%s999_s1 + $0x40] sm:$0xff] (!%p143_p9)  ;;  %vm374_vm2 = vcmask (!%p143_p9), 1041409   ;;  %vm376_vm3 = vcmask (!%p143_p9), 1042434  }
  0x10   : > { %599 = vmatpush3.bf16.msra.mxu0 (!%p143_p9), %v598_v4  ;;  %v607_v18 = vpack.c.bf16 (!%p143_p9), %v350_v12, %v349_v11  ;;  %v352_v22 = vld [vmem:[%s999_s1 + $0x48] sm:$0xff] (!%p143_p9)  ;;  %v851_v27 = vld [vmem:[%s999_s1 + $0x50] sm:$0xff] (!%p143_p9)  ;;  %v856_v28 = vld [vmem:[%s999_s1 + $0x58] sm:$0xff] (!%p143_p9)  ;;  %vm378_vm4 = vcmask (!%p143_p9), 1043459   ;;  %vm380_vm5 = vcmask (!%p143_p9), 1044484   ;;  %vm382_vm6 = vcmask (!%p143_p9), 1045509  }
  0x11   : > { %600 = vmatprep.subr.bf16.mxu0 (!%p143_p9), %v728_v3  ;;  %v610_v37 = vpack.c.bf16 (!%p143_p9), %v352_v22, %v351_v16  ;;  %v867_v38 = vld [vmem:[%s999_s1 + $0x60] sm:$0xff] (!%p143_p9)  ;;  %v872_v39 = vld [vmem:[%s999_s1 + $0x68] sm:$0xff] (!%p143_p9)  ;;  %v877_v40 = vld [vmem:[%s999_s1 + $0x70] sm:$0xff] (!%p143_p9)  ;;  %v613_v57 = vpack.c.bf16 (!%p143_p9), %v856_v28, %v851_v27  ;;  %vm384_vm7 = vcmask (!%p143_p9), 1046534   ;;  %vm386_vm8 = vcmask (!%p143_p9), 1047559   ;;  %s164_s25 = sand.u32 (!%p143_p9), 1, %s718_s13  }
  0x12   : > { %v882_v41 = vld [vmem:[%s999_s1 + $0x78] sm:$0xff] (!%p143_p9)  ;;  %v616_v8 = vpack.c.bf16 (!%p143_p9), %v872_v39, %v867_v38  ;;  %s542_s29 = sshll.u32 (!%p143_p9), %s773_s16, 7  ;;  %s461_s8 = scalar_lea.sflag (!%p143_p9), [#allocation3], %s164_s25 }
  0x13   : > { %v619_v9 = vpack.c.bf16 (!%p143_p9), %v882_v41, %v877_v40  ;;  %s956_s7 = scalar_lea.hbm (!%p143_p9), %s1001_s3, %s542_s29  ;;  %s731_s16 = smov (!%p143_p9), [#allocation2]  }
  0x14   : > { %602 = vmatpush3.bf16.msra.mxu0 (!%p143_p9), %v601_v7 }
  0x15   : > { %s1009_s5 = smov (!%p168_p10, %s538_s5), 31  ;;  %603 = vmatprep.subr.bf16.mxu0 %v728_v3 }
  0x16   : > { %s621_s10 = smul.u32 56, %s1009_s5 }
  0x18   : > { %s831_s26 = scalar_lea.vmem %s998_s0, %s621_s10  ;;  %605 = vmatpush3.bf16.msra.mxu0 %v604_v10  ;;  %s668_s10 = sshll.u32 %s731_s16, 4  ;;  %s669_s10 = int_to_ptr.vmem [resolvable:$false] %s668_s10 }
  0x19   : > { %v174_v13 = vld [vmem:[%s831_s26] sm:$0xff]  ;;  %v175_v14 = vld [vmem:[%s831_s26 + $0x8] sm:$0xff]  ;;  %v176_v15 = vld [vmem:[%s831_s26 + $0x10] sm:$0xff]  ;;  %606 = vmatprep.subr.bf16.mxu0 %v728_v3  ;;  %s670_s11 = scalar_lea.vmem %s669_s10, 256 }
  0x1a   : > { %v230_v17 = vadd.f32 %v175_v14, %v174_v13  ;;  %v177_v19 = vld [vmem:[%s831_s26 + $0x18] sm:$0xff]  ;;  %v182_v21 = vld [vmem:[%s831_s26 + $0x40] sm:$0xff]  ;;  %v183_v24 = vld [vmem:[%s831_s26 + $0x48] sm:$0xff] }
  0x1b   : > { %v181_v20 = vld [vmem:[%s831_s26 + $0x38] sm:$0xff]  ;;  %v178_v23 = vld [vmem:[%s831_s26 + $0x20] sm:$0xff]  ;;  %v179_v29 = vld [vmem:[%s831_s26 + $0x28] sm:$0xff] }
  0x1c   : > { %v231_v25 = vadd.f32 %v230_v17, %v176_v15  ;;  %v244_v26 = vadd.f32 %v182_v21, %v181_v20  ;;  %v184_v30 = vld [vmem:[%s831_s26 + $0x50] sm:$0xff]  ;;  %v189_v33 = vld [vmem:[%s831_s26 + $0x78] sm:$0xff]  ;;  %v190_v34 = vld [vmem:[%s831_s26 + $0x80] sm:$0xff]  ;;  %608 = vmatpush3.bf16.msra.mxu0 %v607_v18 }
  0x1d   : > { %v188_v31 = vld [vmem:[%s831_s26 + $0x70] sm:$0xff]  ;;  %v185_v42 = vld [vmem:[%s831_s26 + $0x58] sm:$0xff]  ;;  %v187_v43 = vld [vmem:[%s831_s26 + $0x68] sm:$0x1]  ;;  %609 = vmatprep.subr.bf16.mxu0 %v728_v3 }
  0x1e   : > { %v180_v32 = vld [vmem:[%s831_s26 + $0x30] sm:$0x1]  ;;  %v232_v35 = vadd.f32 %v231_v25, %v177_v19  ;;  %v245_v36 = vadd.f32 %v244_v26, %v183_v24  ;;  %v191_v44 = vld [vmem:[%s831_s26 + $0x88] sm:$0xff]  ;;  %v257_v45 = vadd.f32 %v189_v33, %v188_v31  ;;  %v197_v48 = vld [vmem:[%s831_s26 + $0xb8] sm:$0xff]  ;;  %v249_v4 = vsel %vm235_vm1, %v187_v43, 0.0 }
  0x1f   : > { %v195_v46 = vld [vmem:[%s831_s26 + $0xa8] sm:$0xff]  ;;  %v196_v47 = vld [vmem:[%s831_s26 + $0xb0] sm:$0xff]  ;;  %v186_v51 = vld [vmem:[%s831_s26 + $0x60] sm:$0xff]  ;;  %v236_v54 = vsel %vm235_vm1, %v180_v32, 0.0 }
  0x20   : > { %v233_v49 = vadd.f32 %v232_v35, %v178_v23  ;;  %v246_v50 = vadd.f32 %v245_v36, %v184_v30  ;;  %v192_v52 = vld [vmem:[%s831_s26 + $0x90] sm:$0xff]  ;;  %v194_v53 = vld [vmem:[%s831_s26 + $0xa0] sm:$0x1]  ;;  %v258_v55 = vadd.f32 %v257_v45, %v190_v34  ;;  %v270_v56 = vadd.f32 %v196_v47, %v195_v46  ;;  %v193_v58 = vld [vmem:[%s831_s26 + $0x98] sm:$0xff]  ;;  %611 = vmatpush3.bf16.msra.mxu0 %v610_v37 }
  0x21   : > { %v198_v59 = vld [vmem:[%s831_s26 + $0xc0] sm:$0xff]  ;;  %v203_v61 = vld [vmem:[%s831_s26 + $0xe8] sm:$0xff]  ;;  %v201_v1 = vld [vmem:[%s831_s26 + $0xd8] sm:$0x1]  ;;  %612 = vmatprep.subr.bf16.mxu0 %v728_v3  ;;  %v262_v19 = vsel %vm235_vm1, %v194_v53, 0.0 }
  0x22   : > { %v202_v60 = vld [vmem:[%s831_s26 + $0xe0] sm:$0xff]  ;;  %v234_v62 = vadd.f32 %v233_v49, %v179_v29  ;;  %v247_v63 = vadd.f32 %v246_v50, %v185_v42  ;;  %v199_v0 = vld [vmem:[%s831_s26 + $0xc8] sm:$0xff]  ;;  %v204_v2 = vld [vmem:[%s831_s26 + $0xf0] sm:$0xff]  ;;  %v259_v5 = vadd.f32 %v258_v55, %v191_v44  ;;  %v271_v6 = vadd.f32 %v270_v56, %v197_v48 }
  0x23   : > { %v283_v7 = vadd.f32 %v203_v61, %v202_v60  ;;  %v205_v10 = vld [vmem:[%s831_s26 + $0xf8] sm:$0xff]  ;;  %v208_v11 = vld [vmem:[%s831_s26 + $0x110] sm:$0x1]  ;;  %v210_v16 = vld [vmem:[%s831_s26 + $0x120] sm:$0xff]  ;;  %v275_v27 = vsel %vm235_vm1, %v201_v1, 0.0 }
  0x24   : > { %v209_v12 = vld [vmem:[%s831_s26 + $0x118] sm:$0xff]  ;;  %v237_v13 = vadd.f32 %v236_v54, %v234_v62  ;;  %v248_v14 = vadd.f32 %v247_v63, %v186_v51  ;;  %v200_v15 = vld [vmem:[%s831_s26 + $0xd0] sm:$0xff]  ;;  %v211_v17 = vld [vmem:[%s831_s26 + $0x128] sm:$0xff]  ;;  %v260_v18 = vadd.f32 %v259_v5, %v192_v52  ;;  %v272_v20 = vadd.f32 %v271_v6, %v198_v59  ;;  %614 = vmatpush3.bf16.msra.mxu0 %v613_v57 }
  0x25   : > { %v284_v21 = vadd.f32 %v283_v7, %v204_v2  ;;  %v206_v22 = vld [vmem:[%s831_s26 + $0x100] sm:$0xff]  ;;  %v212_v23 = vld [vmem:[%s831_s26 + $0x130] sm:$0xff]  ;;  %v215_v24 = vld [vmem:[%s831_s26 + $0x148] sm:$0x1]  ;;  %v296_v28 = vadd.f32 %v210_v16, %v209_v12  ;;  %v288_v35 = vsel %vm235_vm1, %v208_v11, 0.0  ;;  %615 = vmatprep.subr.bf16.mxu0 %v728_v3 }
  0x26   : > { %v238_v25 = vrot.slane %v237_v13, 4  ;;  %v250_v26 = vadd.f32 %v249_v4, %v248_v14  ;;  %v216_v29 = vld [vmem:[%s831_s26 + $0x150] sm:$0xff]  ;;  %v217_v30 = vld [vmem:[%s831_s26 + $0x158] sm:$0xff]  ;;  %v218_v31 = vld [vmem:[%s831_s26 + $0x160] sm:$0xff]  ;;  %v261_v32 = vadd.f32 %v260_v18, %v193_v58  ;;  %v273_v33 = vadd.f32 %v272_v20, %v199_v0 }
  0x27   : > { %v285_v34 = vadd.f32 %v284_v21, %v205_v10  ;;  %v207_v36 = vld [vmem:[%s831_s26 + $0x108] sm:$0xff]  ;;  %v297_v39 = vadd.f32 %v296_v28, %v211_v17  ;;  %v309_v42 = vadd.f32 %v217_v30, %v216_v29  ;;  %v213_v43 = vld [vmem:[%s831_s26 + $0x138] sm:$0xff]  ;;  %v222_v45 = vld [vmem:[%s831_s26 + $0x180] sm:$0x1]  ;;  %v301_v49 = vsel %vm235_vm1, %v215_v24, 0.0 }
  0x28   : > { %v239_v37 = vadd.f32 %v238_v25, %v237_v13  ;;  %v251_v38 = vrot.slane %v250_v26, 4  ;;  %v219_v44 = vld [vmem:[%s831_s26 + $0x168] sm:$0xff]  ;;  %v263_v46 = vadd.f32 %v262_v19, %v261_v32  ;;  %v274_v47 = vadd.f32 %v273_v33, %v200_v15  ;;  %v224_v51 = vld [vmem:[%s831_s26 + $0x190] sm:$0xff]  ;;  %617 = vmatpush3.bf16.msra.mxu0 %v616_v8  ;;  %v214_v56 = vld [vmem:[%s831_s26 + $0x140] sm:$0xff] }
  0x29   : > { %v286_v48 = vadd.f32 %v285_v34, %v206_v22  ;;  %v223_v50 = vld [vmem:[%s831_s26 + $0x188] sm:$0xff]  ;;  %v298_v54 = vadd.f32 %v297_v39, %v212_v23  ;;  %v310_v55 = vadd.f32 %v309_v42, %v218_v31  ;;  %v220_v57 = vld [vmem:[%s831_s26 + $0x170] sm:$0xff]  ;;  %v314_v61 = vsel %vm235_vm1, %v222_v45, 0.0  ;;  %618 = vmatprep.subr.bf16.mxu0 %v728_v3  ;;  %v225_v62 = vld [vmem:[%s831_s26 + $0x198] sm:$0xff] }
  0x2a   : > { %v240_v52 = vrot.slane %v239_v37, 2  ;;  %v252_v53 = vadd.f32 %v251_v38, %v250_v26  ;;  %v264_v58 = vrot.slane %v263_v46, 4  ;;  %v276_v59 = vadd.f32 %v275_v27, %v274_v47  ;;  %v221_v4 = vld [vmem:[%s831_s26 + $0x178] sm:$0xff]  ;;  %v226_v10 = vld [vmem:[%s831_s26 + $0x1a0] sm:$0xff]  ;;  %v227_v19 = vld [vmem:[%s831_s26 + $0x1a8] sm:$0xff] }
  0x2b   : > { %v287_v60 = vadd.f32 %v286_v48, %v207_v36  ;;  %v299_v1 = vadd.f32 %v298_v54, %v213_v43  ;;  %v311_v2 = vadd.f32 %v310_v55, %v219_v44  ;;  %v322_v8 = vadd.f32 %v224_v51, %v223_v50  ;;  %v229_v3 = vld [vmem:[%s831_s26 + $0x1b8] sm:$0x1]  ;;  %v228_v28 = vld [vmem:[%s831_s26 + $0x1b0] sm:$0xff]  ;;  %s537_s26 = sshll.u32 %s164_s25, 3 }
  0x2c   : > { %v241_v63 = vadd.f32 %v240_v52, %v239_v37  ;;  %v253_v0 = vrot.slane %v252_v53, 2  ;;  %v265_v5 = vadd.f32 %v264_v58, %v263_v46  ;;  %v277_v6 = vrot.slane %v276_v59, 4  ;;  %620 = vmatpush3.bf16.msra.mxu0 %v619_v9  ;;  %s166_s30 = scalar_lea.vmem [#allocation2], %s537_s26 }
  0x2d   : > { %v289_v7 = vadd.f32 %v288_v35, %v287_v60  ;;  %v300_v13 = vadd.f32 %v299_v1, %v214_v56  ;;  %v312_v14 = vadd.f32 %v311_v2, %v220_v57  ;;  %v323_v18 = vadd.f32 %v322_v8, %v225_v62  ;;  %s474_s4 = sshll.u32 %s166_s30, 4  ;;  %s958_s4 = int_to_ptr.vmem [resolvable:$true] %s474_s4 }
  0x2e   : > { %v242_v11 = vrot.slane %v241_v63, 1  ;;  %v254_v12 = vadd.f32 %v253_v0, %v252_v53  ;;  %v266_v15 = vrot.slane %v265_v5, 2  ;;  %v278_v16 = vadd.f32 %v277_v6, %v276_v59  ;;  %s664_s9 = scalar_lea.vmem %s958_s4, 128  ;;  %p671_p0 = scmp.lt.s32.totalorder %s958_s4, %s669_s10 }
  0x2f   : > { %v290_v17 = vrot.slane %v289_v7, 4  ;;  %v302_v22 = vadd.f32 %v301_v49, %v300_v13  ;;  %v313_v23 = vadd.f32 %v312_v14, %v221_v4  ;;  %v324_v27 = vadd.f32 %v323_v18, %v226_v10  ;;  %v540_v14 = vld [vmem:[%s1000_s2] ss:$0 sm:$0xff]  ;;  %p665_p11 = scmp.ne.s32.totalorder %s958_s4, %s664_s9  ;;  %p672_p1 = scmp.lt.s32.totalorder %s670_s11, %s664_s9 }
  0x30   : > { %v243_v20 = vadd.f32 %v242_v11, %v241_v63  ;;  %v255_v21 = vrot.slane %v254_v12, 1  ;;  %v267_v24 = vadd.f32 %v266_v15, %v265_v5  ;;  %v279_v25 = vrot.slane %v278_v16, 2 }
  0x31   : > { %v291_v26 = vadd.f32 %v290_v17, %v289_v7  ;;  %v303_v30 = vrot.slane %v302_v22, 4  ;;  %v315_v40 = vadd.f32 %v314_v61, %v313_v23  ;;  %v327_v41 = vsel %vm235_vm1, %v229_v3, 0.0  ;;  %p666_p12 = pnand %p665_p11, %p790_p5  ;;  %p673_p2 = por %p672_p1, %p671_p0 }
  0x32   : > { %v256_v29 = vadd.f32 %v255_v21, %v254_v12  ;;  %v268_v9 = vrot.slane %v267_v24, 1  ;;  %v280_v31 = vadd.f32 %v279_v25, %v278_v16  ;;  %v325_v33 = vadd.f32 %v324_v27, %v227_v19 }
  0x33   : > { %v292_v32 = vrot.slane %v291_v26, 2  ;;  %v304_v34 = vadd.f32 %v303_v30, %v302_v22  ;;  %v316_v35 = vrot.slane %v315_v40, 4  ;;  %v335_v36 = vmul.f32 0.020408163, %v243_v20  ;;  %p667_p13 = pneg %p666_p12 }
  0x34   : > { %v336_v37 = vmul.f32 0.020408163, %v256_v29  ;;  %v269_v38 = vadd.f32 %v268_v9, %v267_v24  ;;  %v281_v39 = vrot.slane %v280_v31, 1  ;;  %v326_v43 = vadd.f32 %v325_v33, %v228_v28 }
  0x35   : > { %v293_v42 = vadd.f32 %v292_v32, %v291_v26  ;;  %v305_v44 = vrot.slane %v304_v34, 2  ;;  %v317_v45 = vadd.f32 %v316_v35, %v315_v40  ;;  %p674_p3 = pnand %p673_p2, %p667_p13 }
  0x36   : > { %v375_v46 = vsel %vm374_vm2, %v336_v37, %v335_v36  ;;  %v282_v47 = vadd.f32 %v281_v39, %v280_v31  ;;  %v328_v49 = vadd.f32 %v327_v41, %v326_v43  ;;  %v337_v50 = vmul.f32 0.020408163, %v269_v38 }
  0x37   : > { %v294_v48 = vrot.slane %v293_v42, 1  ;;  %v306_v51 = vadd.f32 %v305_v44, %v304_v34  ;;  %v318_v52 = vrot.slane %v317_v45, 2 }
  0x38   : > { %v329_v54 = vrot.slane %v328_v49, 4  ;;  %v338_v55 = vmul.f32 0.020408163, %v282_v47  ;;  %v377_v56 = vsel %vm376_vm3, %v337_v50, %v375_v46 }
  0x39   : > { %v295_v53 = vadd.f32 %v294_v48, %v293_v42  ;;  %v307_v57 = vrot.slane %v306_v51, 1  ;;  %v319_v58 = vadd.f32 %v318_v52, %v317_v45 }
  0x3a   : > { %v330_v59 = vadd.f32 %v329_v54, %v328_v49  ;;  %v379_v61 = vsel %vm378_vm4, %v338_v55, %v377_v56 }
  0x3b   : > { %v339_v60 = vmul.f32 0.020408163, %v295_v53  ;;  %v308_v62 = vadd.f32 %v307_v57, %v306_v51  ;;  %v320_v63 = vrot.slane %v319_v58, 1 }
  0x3c   : > { %v331_v0 = vrot.slane %v330_v59, 2 }
  0x3d   : > { %v321_v1 = vadd.f32 %v320_v63, %v319_v58  ;;  %v340_v2 = vmul.f32 0.020408163, %v308_v62  ;;  %v381_v4 = vsel %vm380_vm5, %v339_v60, %v379_v61 }
  0x3e   : > { %v332_v5 = vadd.f32 %v331_v0, %v330_v59 }
  0x3f   : > { %v341_v6 = vmul.f32 0.020408163, %v321_v1  ;;  %v383_v8 = vsel %vm382_vm6, %v340_v2, %v381_v4 }
  0x40   : > { %v333_v7 = vrot.slane %v332_v5, 1 }
  0x41   : > { %v385_v11 = vsel %vm384_vm7, %v341_v6, %v383_v8 }
  0x42   : > { %v334_v10 = vadd.f32 %v333_v7, %v332_v5 }
  0x44   : > { %v342_v12 = vmul.f32 0.020408163, %v334_v10 }
  0x46   : > { %v387_v13 = vsel %vm386_vm8, %v342_v12, %v385_v11 }
  0x47   : > { %595 = vmatmul.mubr.f32.vlgmr.msra.gmra.mrb[0].mxu0 %v387_v13 }
 0x11a   : > { %v455_v3 = vpop.f32.mrb[0].mxu0 }
 0x11b   : > { %v456_v15 = vadd.f32 %v540_v14, %v455_v3  ;;  %v596_v16 = vpop.f32.mrb[1].mxu0 }
 0x11d   : > { %459 = vst [vmem:[%s166_s30] sm:$0xff] %v456_v15 }
 0x11e   : > { %677 = shalt.err (!%p674_p3)
}
 0x11f   : > { %s678_s17 = scalar_lea.hbm %s956_s7, 128  ;;  %s682_s24 = scalar_lea.hbm %s1001_s3, 512 }
 0x120   : > { %p679_p4 = scmp.ne.s32.totalorder %s956_s7, %s678_s17  ;;  %p683_p9 = scmp.lt.u32.totalorder %s956_s7, %s1001_s3 }
 0x121   : > { %p684_p10 = scmp.lt.u32.totalorder %s682_s24, %s678_s17  ;;  %p686_p12 = scmp.lt.u32.totalorder %s678_s17, %s956_s7 }
 0x122   : > { %p680_p7 = pnand %p679_p4, %p790_p5 }
 0x123   : > { %p685_p11 = por %p684_p10, %p683_p9 }
 0x124   : > { %p681_p8 = pneg %p680_p7 }
 0x125   : > { %p687_p13 = por %p686_p12, %p685_p11 }
 0x127   : > { %p688_p0 = pnand %p687_p13, %p681_p8 }
 0x129   : > { %691 = shalt.err (!%p688_p0)
}
 0x12a   : > { %622 = dma.vmem_to_hbm [thread:$0]  (%p790_p5), %s958_s4, 128, %s956_s7, %s461_s8  }
 0x12b PF: > { %p628_p1 = scmp.ge.s32.totalorder %s726_s15, 2  ;;  %s486_s27 = sand.u32 1, %s714_s12  }
 0x12c   : > { %s487_s28 = scalar_lea.sflag [#allocation3], %s486_s27 }
 0x12d   : > { %p625_p2 = pnand %p628_p1, %p794_p6 }
 0x12f   : > { %709 = dma.done.wait (!%p625_p2), %s487_s28, 128  }
 0x130   : > { %711 = vsyncadd (!%p625_p2), %s487_s28, 4294967168  ;;  %p13_p3 = scmp.ge.s32.totalorder %s777_s18, 6   ;;  %s1004_s12 = smov %s718_s13 }
 0x131   : > { %s1005_s13 = smov %s722_s14  ;;  %s1006_s14 = smov %s788_s21 }
 0x132   : > { %s1007_s15 = smov %s777_s18  ;;  %15 = sbr.rel (!%p13_p3) target bundleno = 3 (0x3), region = 67 }
 0x139   :  { %492 = vsyncpa [#allocation3], 1 }
 0x13a   :  { %494 = vsyncpa [#allocation3 + $0x1], 1 }

</bundles_post_ra>
